<compile_context>
chip_gen: v7x
topology: tpu7x:2x2x1
jax: 0.10.0
libtpu: 0.0.40
codegen_flags: <defaults>
</compile_context>

<pallas_src>
import functools

import jax
import jax.numpy as jnp
from jax.experimental import pallas as pl
from jax.experimental.pallas import tpu as pltpu


def _round_up(x, m):
    return (x + m - 1) // m * m


def _ce_kernel(pred_ref, label_ref, out_ref, m_ref, l_ref, picked_ref,
               *, n_valid, tile_n, tile_c):
    """Streaming cross-entropy over class tiles.

    pred_ref   : (TILE_N, TILE_C) logits tile (native dtype), upcast here
    label_ref  : (TILE_N, 1) int32 labels for this row tile
    out_ref    : (TILE_N, 1) f32 per-row loss (written on the last class tile)
    m_ref / l_ref / picked_ref : (TILE_N, 1) f32 scratch
        running row max / running scaled exp-sum / gathered label logit
    """
    i = pl.program_id(0)                 # row-tile index (parallel)
    j = pl.program_id(1)                 # class-tile index (reduction, innermost)
    n_col_tiles = pl.num_programs(1)

    @pl.when(j == 0)
    def _():
        m_ref[...] = jnp.full_like(m_ref, -jnp.inf)
        l_ref[...] = jnp.zeros_like(l_ref)
        picked_ref[...] = jnp.zeros_like(picked_ref)

    s = pred_ref[...].astype(jnp.float32)                      # (TILE_N, TILE_C)
    labels = label_ref[...]                                    # (TILE_N, 1) int32

    # Gather the label logit with a select (no one-hot f32 temporary).
    col_ids = jax.lax.broadcasted_iota(jnp.int32, (tile_n, tile_c), 1) + j * tile_c
    picked_ref[...] += jnp.sum(jnp.where(col_ids == labels, s, 0.0),
                               axis=-1, keepdims=True)

    # Online logsumexp update (exactly one exp per logit).
    tile_max = jnp.max(s, axis=-1, keepdims=True)              # (TILE_N, 1)
    m_new = jnp.maximum(m_ref[...], tile_max)
    alpha = jnp.exp(m_ref[...] - m_new)                        # exp(-inf) = 0 on first tile
    l_ref[...] = alpha * l_ref[...] + jnp.sum(jnp.exp(s - m_new),
                                              axis=-1, keepdims=True)
    m_ref[...] = m_new

    @pl.when(j == n_col_tiles - 1)
    def _():
        lse = m_ref[...] + jnp.log(l_ref[...])                 # (TILE_N, 1)
        per_row = lse - picked_ref[...]
        # Zero rows that are batch padding so the wrapper can sum blindly.
        row_ids = jax.lax.broadcasted_iota(jnp.int32, (tile_n, 1), 0) + i * tile_n
        out_ref[...] = jnp.where(row_ids < n_valid, per_row, 0.0)


def ce_loss(pred, label, *, tile_n=None, tile_c=None):
    """Pallas equivalent of CELoss.forward(pred, label).

    pred : (N, C) float logits (f32 or bf16 — streamed in native dtype)
    label: (N,)   integer class indices
    """
    n, c = pred.shape
    label = label.astype(jnp.int32)

    # Lane/sublane-aligned tile sizes.
    c_pad128 = _round_up(c, 128)
    if tile_c is None:
        tile_c = min(c_pad128, 512)        # lane-dense, multiple of 128
    c_pad = _round_up(c, tile_c)
    if tile_n is None:
        tile_n = min(_round_up(n, 8), 256)  # multiple of 8 sublanes
    n_pad = _round_up(n, tile_n)

    # Pad classes with -inf (drops out of max/exp), rows with 0 (masked later).
    pred_p = pred
    if c_pad > c:
        pad_cols = jnp.full((n, c_pad - c), -jnp.inf, dtype=pred.dtype)
        pred_p = jnp.concatenate([pred_p, pad_cols], axis=1)
    if n_pad > n:
        pad_rows = jnp.zeros((n_pad - n, c_pad), dtype=pred.dtype)
        pred_p = jnp.concatenate([pred_p, pad_rows], axis=0)
    label_p = jnp.pad(label, (0, n_pad - n)).reshape(n_pad, 1)
    # TODO(synk): labels live as a lane-sparse (N,1) int32 VMEM block; bytes are
    # negligible vs. logits, but could be moved to SMEM / scalar-prefetch later.

    grid = (n_pad // tile_n, c_pad // tile_c)
    kernel = functools.partial(_ce_kernel, n_valid=n, tile_n=tile_n, tile_c=tile_c)

    per_row = pl.pallas_call(
        kernel,
        out_shape=jax.ShapeDtypeStruct((n_pad, 1), jnp.float32),
        grid_spec=pltpu.PrefetchScalarGridSpec(
            num_scalar_prefetch=0,
            grid=grid,
            in_specs=[
                pl.BlockSpec((tile_n, tile_c), lambda i, j: (i, j)),   # logits
                pl.BlockSpec((tile_n, 1), lambda i, j: (i, 0)),        # labels
            ],
            out_specs=pl.BlockSpec((tile_n, 1), lambda i, j: (i, 0)),
            scratch_shapes=[pltpu.VMEM((tile_n, 1), jnp.float32)] * 3,
        ),
        compiler_params=pltpu.CompilerParams(
            dimension_semantics=("parallel", "arbitrary"),
            vmem_limit_bytes=32 * 1024 * 1024,
        ),
    )(pred_p, label_p)

    loss = jnp.sum(per_row) / jnp.float32(n)
    # Second return value of the PyTorch module: torch.Tensor([0]).
    return loss, jnp.zeros((1,), dtype=jnp.float32)


def _ref_ce(pred, label):
    logp = jax.nn.log_softmax(pred.astype(jnp.float32), axis=-1)
    return -jnp.mean(jnp.take_along_axis(logp, label[:, None], axis=-1))


if __name__ == "__main__":
    key = jax.random.PRNGKey(0)

    # Primary small-shape run (batch=8, num_classes=32).
    k_pred, k_label = jax.random.split(key)
    N, C = 8, 32
    pred = jax.random.normal(k_pred, (N, C), dtype=jnp.float32)
    label = jax.random.randint(k_label, (N,), 0, C, dtype=jnp.int32)

    loss, aux = ce_loss(pred, label)
    jax.block_until_ready((loss, aux))
    ref = _ref_ce(pred, label)
    assert jnp.allclose(loss, ref, atol=1e-5, rtol=1e-5), (loss, ref)

    # Extra check that exercises the 2-D grid, padding and online logsumexp.
    k_pred2, k_label2 = jax.random.split(jax.random.PRNGKey(1))
    N2, C2 = 20, 300
    pred2 = jax.random.normal(k_pred2, (N2, C2), dtype=jnp.float32)
    label2 = jax.random.randint(k_label2, (N2,), 0, C2, dtype=jnp.int32)
    loss2, _ = ce_loss(pred2, label2, tile_n=8, tile_c=128)
    jax.block_until_ready(loss2)
    ref2 = _ref_ce(pred2, label2)
    assert jnp.allclose(loss2, ref2, atol=1e-4, rtol=1e-5), (loss2, ref2)

    print("KERNEL_OK")
</pallas_src>

<mosaic_0001>
module attributes {stable_mosaic.version = 11 : i64} {
  func.func @_ce_kernel(%arg0: i32, %arg1: i32, %arg2: memref<8x128xf32, #tpu.memory_space<vmem>>, %arg3: memref<8x1xi32, #tpu.memory_space<vmem>>, %arg4: memref<8x1xf32, #tpu.memory_space<vmem>>, %arg5: memref<8x1xf32, #tpu.memory_space<vmem>>, %arg6: memref<8x1xf32, #tpu.memory_space<vmem>>, %arg7: memref<8x1xf32, #tpu.memory_space<vmem>>) attributes {dimension_semantics = [#tpu.dimension_semantics<parallel>, #tpu.dimension_semantics<arbitrary>], iteration_bounds = array<i64: 1, 1>, scalar_prefetch = 0 : i64, scratch_operands = 3 : i64, tpu.core_type = #tpu.core_type<tc>, window_params = [{transform_indices = @transform_0, window_bounds = array<i64: 8, 128>}, {transform_indices = @transform_1, window_bounds = array<i64: 8, 1>}, {transform_indices = @transform_2, window_bounds = array<i64: 8, 1>}]} {
    %c0_i32 = arith.constant 0 : i32
    %0 = arith.cmpi eq, %arg1, %c0_i32 : i32
    %1 = arith.extui %0 : i1 to i32
    %c0_i32_0 = arith.constant 0 : i32
    %2 = arith.cmpi ne, %1, %c0_i32_0 : i32
    scf.if %2 {
      %cst_23 = arith.constant 0xFF800000 : f32
      %38 = vector.broadcast %cst_23 : f32 to vector<8x1xf32>
      %c0_24 = arith.constant 0 : index
      %c0_25 = arith.constant 0 : index
      %39 = vector.load %arg5[%c0_24, %c0_25] : memref<8x1xf32, #tpu.memory_space<vmem>>, vector<8x1xf32>
      tpu.vector_store %arg5[%c0_24, %c0_25], %38 {strides = array<i32>} : memref<8x1xf32, #tpu.memory_space<vmem>>, vector<8x1xf32>,
      %cst_26 = arith.constant 0.000000e+00 : f32
      %40 = vector.broadcast %cst_26 : f32 to vector<8x1xf32>
      %c0_27 = arith.constant 0 : index
      %c0_28 = arith.constant 0 : index
      %41 = vector.load %arg6[%c0_27, %c0_28] : memref<8x1xf32, #tpu.memory_space<vmem>>, vector<8x1xf32>
      tpu.vector_store %arg6[%c0_27, %c0_28], %40 {strides = array<i32>} : memref<8x1xf32, #tpu.memory_space<vmem>>, vector<8x1xf32>,
      %cst_29 = arith.constant 0.000000e+00 : f32
      %42 = vector.broadcast %cst_29 : f32 to vector<8x1xf32>
      %c0_30 = arith.constant 0 : index
      %c0_31 = arith.constant 0 : index
      %43 = vector.load %arg7[%c0_30, %c0_31] : memref<8x1xf32, #tpu.memory_space<vmem>>, vector<8x1xf32>
      tpu.vector_store %arg7[%c0_30, %c0_31], %42 {strides = array<i32>} : memref<8x1xf32, #tpu.memory_space<vmem>>, vector<8x1xf32>,
    } else {
    }
    %c0 = arith.constant 0 : index
    %c0_1 = arith.constant 0 : index
    %3 = vector.load %arg2[%c0, %c0_1] : memref<8x128xf32, #tpu.memory_space<vmem>>, vector<8x128xf32>
    %c0_2 = arith.constant 0 : index
    %c0_3 = arith.constant 0 : index
    %4 = vector.load %arg3[%c0_2, %c0_3] : memref<8x1xi32, #tpu.memory_space<vmem>>, vector<8x1xi32>
    %5 = tpu.iota {dimensions = array<i32: 1>} : vector<8x128xi32>
    %c128_i32 = arith.constant 128 : i32
    %6 = arith.muli %arg1, %c128_i32 : i32
    %7 = vector.broadcast %6 : i32 to vector<8x128xi32>
    %8 = arith.addi %5, %7 : vector<8x128xi32>
    %c0_4 = arith.constant 0 : index
    %c0_5 = arith.constant 0 : index
    %9 = vector.load %arg7[%c0_4, %c0_5] : memref<8x1xf32, #tpu.memory_space<vmem>>, vector<8x1xf32>
    %10 = vector.broadcast %4 : vector<8x1xi32> to vector<8x128xi32>
    %11 = arith.cmpi eq, %8, %10 : vector<8x128xi32>
    %cst = arith.constant 0.000000e+00 : f32
    %12 = vector.broadcast %cst : f32 to vector<8x128xf32>
    %13 = arith.select %11, %3, %12 : vector<8x128xi1>, vector<8x128xf32>
    %cst_6 = arith.constant dense<0.000000e+00> : vector<8xf32>
    %14 = vector.multi_reduction <add>, %13, %cst_6 [1] : vector<8x128xf32> to vector<8xf32>
    %15 = vector.shape_cast %14 : vector<8xf32> to vector<8x1xf32>
    %16 = arith.addf %9, %15 : vector<8x1xf32>
    %c0_7 = arith.constant 0 : index
    %c0_8 = arith.constant 0 : index
    %17 = vector.load %arg7[%c0_7, %c0_8] : memref<8x1xf32, #tpu.memory_space<vmem>>, vector<8x1xf32>
    tpu.vector_store %arg7[%c0_7, %c0_8], %16 {strides = array<i32>} : memref<8x1xf32, #tpu.memory_space<vmem>>, vector<8x1xf32>,
    %cst_9 = arith.constant dense<0xFF800000> : vector<8xf32>
    %18 = vector.multi_reduction <maximumf>, %3, %cst_9 [1] : vector<8x128xf32> to vector<8xf32>
    %19 = vector.shape_cast %18 : vector<8xf32> to vector<8x1xf32>
    %c0_10 = arith.constant 0 : index
    %c0_11 = arith.constant 0 : index
    %20 = vector.load %arg5[%c0_10, %c0_11] : memref<8x1xf32, #tpu.memory_space<vmem>>, vector<8x1xf32>
    %21 = arith.maximumf %20, %19 : vector<8x1xf32>
    %c0_12 = arith.constant 0 : index
    %c0_13 = arith.constant 0 : index
    %22 = vector.load %arg5[%c0_12, %c0_13] : memref<8x1xf32, #tpu.memory_space<vmem>>, vector<8x1xf32>
    %23 = arith.subf %22, %21 : vector<8x1xf32>
    %24 = math.exp %23 : vector<8x1xf32>
    %c0_14 = arith.constant 0 : index
    %c0_15 = arith.constant 0 : index
    %25 = vector.load %arg6[%c0_14, %c0_15] : memref<8x1xf32, #tpu.memory_space<vmem>>, vector<8x1xf32>
    %26 = arith.mulf %24, %25 : vector<8x1xf32>
    %27 = vector.broadcast %21 : vector<8x1xf32> to vector<8x128xf32>
    %28 = arith.subf %3, %27 : vector<8x128xf32>
    %29 = math.exp %28 : vector<8x128xf32>
    %cst_16 = arith.constant dense<0.000000e+00> : vector<8xf32>
    %30 = vector.multi_reduction <add>, %29, %cst_16 [1] : vector<8x128xf32> to vector<8xf32>
    %31 = vector.shape_cast %30 : vector<8xf32> to vector<8x1xf32>
    %32 = arith.addf %26, %31 : vector<8x1xf32>
    %c0_17 = arith.constant 0 : index
    %c0_18 = arith.constant 0 : index
    %33 = vector.load %arg6[%c0_17, %c0_18] : memref<8x1xf32, #tpu.memory_space<vmem>>, vector<8x1xf32>
    tpu.vector_store %arg6[%c0_17, %c0_18], %32 {strides = array<i32>} : memref<8x1xf32, #tpu.memory_space<vmem>>, vector<8x1xf32>,
    %c0_19 = arith.constant 0 : index
    %c0_20 = arith.constant 0 : index
    %34 = vector.load %arg5[%c0_19, %c0_20] : memref<8x1xf32, #tpu.memory_space<vmem>>, vector<8x1xf32>
    tpu.vector_store %arg5[%c0_19, %c0_20], %21 {strides = array<i32>} : memref<8x1xf32, #tpu.memory_space<vmem>>, vector<8x1xf32>,
    %c0_i32_21 = arith.constant 0 : i32
    %35 = arith.cmpi eq, %arg1, %c0_i32_21 : i32
    %36 = arith.extui %35 : i1 to i32
    %c0_i32_22 = arith.constant 0 : i32
    %37 = arith.cmpi ne, %36, %c0_i32_22 : i32
    scf.if %37 {
      %c0_23 = arith.constant 0 : index
      %c0_24 = arith.constant 0 : index
      %38 = vector.load %arg5[%c0_23, %c0_24] : memref<8x1xf32, #tpu.memory_space<vmem>>, vector<8x1xf32>
      %c0_25 = arith.constant 0 : index
      %c0_26 = arith.constant 0 : index
      %39 = vector.load %arg6[%c0_25, %c0_26] : memref<8x1xf32, #tpu.memory_space<vmem>>, vector<8x1xf32>
      %40 = math.log %39 : vector<8x1xf32>
      %41 = arith.addf %38, %40 : vector<8x1xf32>
      %c0_27 = arith.constant 0 : index
      %c0_28 = arith.constant 0 : index
      %42 = vector.load %arg7[%c0_27, %c0_28] : memref<8x1xf32, #tpu.memory_space<vmem>>, vector<8x1xf32>
      %43 = arith.subf %41, %42 : vector<8x1xf32>
      %44 = tpu.iota {dimensions = array<i32: 0>} : vector<8x1xi32>
      %c8_i32 = arith.constant 8 : i32
      %45 = arith.muli %arg0, %c8_i32 : i32
      %46 = vector.broadcast %45 : i32 to vector<8x1xi32>
      %47 = arith.addi %44, %46 : vector<8x1xi32>
      %c8_i32_29 = arith.constant 8 : i32
      %48 = vector.broadcast %c8_i32_29 : i32 to vector<8x1xi32>
      %49 = arith.cmpi slt, %47, %48 : vector<8x1xi32>
      %cst_30 = arith.constant 0.000000e+00 : f32
      %50 = vector.broadcast %cst_30 : f32 to vector<8x1xf32>
      %51 = arith.select %49, %43, %50 : vector<8x1xi1>, vector<8x1xf32>
      %c0_31 = arith.constant 0 : index
      %c0_32 = arith.constant 0 : index
      %52 = vector.load %arg4[%c0_31, %c0_32] : memref<8x1xf32, #tpu.memory_space<vmem>>, vector<8x1xf32>
      tpu.vector_store %arg4[%c0_31, %c0_32], %51 {strides = array<i32>} : memref<8x1xf32, #tpu.memory_space<vmem>>, vector<8x1xf32>,
    } else {
    }
    return
  }
  func.func @transform_0(%arg0: i32, %arg1: i32) -> (i32, i32) {
    %c0_i32 = arith.constant 0 : i32
    return %arg0, %arg1 : i32, i32
  }
  func.func @transform_1(%arg0: i32, %arg1: i32) -> (i32, i32) {
    %c0_i32 = arith.constant 0 : i32
    %c0_i32_0 = arith.constant 0 : i32
    return %arg0, %c0_i32 : i32, i32
  }
  func.func @transform_2(%arg0: i32, %arg1: i32) -> (i32, i32) {
    %c0_i32 = arith.constant 0 : i32
    %c0_i32_0 = arith.constant 0 : i32
    return %arg0, %c0_i32 : i32, i32
  }
}

</mosaic_0001>

<bundles_post_ra>
// kernel: tpu_custom_call.1
= control target key start
LH: loop header
LB: loop body
LE: loop exit
PB: predicated region body
PF: predicated region fallthrough
CT: control target
= control target key end

     0   :  { %vm15_vm0 = vcmask 7168   ;;  %v92_v1 = vmov -inf   ;;  %v93_v2 = vmov 0   ;;  %v94_v3 = vmov 0.0   ;;  %s126_s0 = inlined_call_operand.vmem [shape: f32[8,128], index: 0, kind: input, shape index: {}]   ;;  %s127_s1 = inlined_call_operand.vmem [shape: s32[8,1], index: 1, kind: input, shape index: {}]   ;;  %s128_s2 = inlined_call_operand.vmem [shape: f32[8,1], index: 2, kind: output, shape index: {}]  }
   0x1   :  { %v19_v0 = vld [vmem:[%s126_s0] sm:$0xff]  ;;  %16 = vst.msk [vmem:[#allocation2] sm:$0xff] %vm15_vm0, %v92_v1  ;;  %84 = vset.pattern.permute.xlu0 %v93_v2  ;;  %85 = vset.pattern.permute.xlu1 %v93_v2  ;;  %17 = vst.msk [vmem:[#allocation3] sm:$0xff] %vm15_vm0, %v94_v3  ;;  %v21_v12 = vlaneseq }
   0x2   :  { %37 = vmax.xlane.f32.xlu0 %v19_v0  ;;  %18 = vst.msk [vmem:[#allocation4] sm:$0xff] %vm15_vm0, %v94_v3  ;;  %v20_v4 = vld [vmem:[%s127_s1] sm:$0xff] }
   0x3   :  { %28 = vperm.xlu1 %85, %v20_v4   ;;  %v22_v13 = vand.u32 127, %v21_v12 }
   0x8   :  { %v39_v5 = vld [vmem:[#allocation2] sm:$0xff]  ;;  %v44_v19 = vld [vmem:[#allocation3] sm:$0xff] }
   0x9   :  { %v26_v23 = vld [vmem:[#allocation4] sm:$0xff] }
  0x82   :  { %v29_v14 = vpop.permute.xlu1 %28 }
  0x83   :  { %vm30_vm1 = vcmp.eq.s32.totalorder %v22_v13, %v29_v14 }
  0x84   :  { %v31_v16 = vsel %vm30_vm1, %v19_v0, 0.0 }
  0x8f   :  { %v38_v6 = vpop.xlane.xlu0 %37 }
  0x90   :  { %v40_v7 = vmax.f32 %v39_v5, %v38_v6 }
  0x92   :  { %v41_v8 = vsub.f32 %v39_v5, %v40_v7  ;;  %58 = vst.msk [vmem:[#allocation2] sm:$0xff] %vm15_vm0, %v40_v7  ;;  %48 = vperm.xlu0 %84, %v40_v7  }
  0x94   :  { %v42_v17 = vmul.f32 1.442695, %v41_v8 }
  0x99   :  { %v62_v29 = vld [vmem:[#allocation2] sm:$0xff] }
 0x111   :  { %v49_v9 = vpop.permute.xlu0 %48 }
 0x112   :  { %v51_v10 = vsub.f32 %v19_v0, %v49_v9 }
 0x114   :  { %v52_v11 = vmul.f32 1.442695, %v51_v10 }
 0x116   :  { %86 = vpow2.f32 %v52_v11 }
 0x117   :  { %88 = vpow2.f32 %v42_v17 }
 0x120   :  { %v87_v15 = vpop.eup %86 }
 0x121   :  { %54 = vadd.xlane.f32.xlu1 %v87_v15  ;;  %v89_v18 = vpop.eup %88 }
 0x122   :  { %v45_v20 = vmul.f32 %v89_v18, %v44_v19 }
 0x125   :  { %32 = vadd.xlane.f32.xlu1 %v31_v16 }
 0x1ae   :  { %v55_v21 = vpop.xlane.xlu1 %54 }
 0x1af   :  { %v56_v22 = vadd.f32 %v55_v21, %v45_v20 }
 0x1b1   :  { %57 = vst.msk [vmem:[#allocation3] sm:$0xff] %vm15_vm0, %v56_v22 }
 0x1b2   :  { %v33_v24 = vpop.xlane.xlu1 %32 }
 0x1b3   :  { %v34_v25 = vadd.f32 %v33_v24, %v26_v23 }
 0x1b5   :  { %36 = vst.msk [vmem:[#allocation4] sm:$0xff] %vm15_vm0, %v34_v25 }
 0x1b8   :  { %v63_v26 = vld [vmem:[#allocation3] sm:$0xff] }
 0x1b9   :  { %90 = vlog2.f32 %v63_v26 }
 0x1bc   :  { %v67_v30 = vld [vmem:[#allocation4] sm:$0xff] }
 0x1c3   :  { %v91_v27 = vpop.eup %90 }
 0x1c4   :  { %v65_v28 = vmul.f32 0.6931472, %v91_v27 }
 0x1c6   :  { %v66_v31 = vadd.f32 %v65_v28, %v62_v29 }
 0x1c8   :  { %v68_v32 = vsub.f32 %v66_v31, %v67_v30 }
 0x1ca   :  { %76 = vst.msk [vmem:[%s128_s2] sm:$0xff] %vm15_vm0, %v68_v32 }

</bundles_post_ra>
